<compile_context>
chip_gen: v5e
topology: v5e:2x2
jax: 0.10.0
libtpu: 0.0.40
codegen_flags: <defaults>
</compile_context>

<pallas_src>
import functools

import jax
import jax.numpy as jnp
from jax.experimental import pallas as pl
from jax.experimental.pallas import tpu as pltpu

# ------------------------- module constants (from __init__) -------------------------
QINT16_MIN = -32768.0
QINT16_MAX = 32767.0

DENSE_XMIN, DENSE_XMAX = 0.01, 1.0
SPARSE_XMIN, SPARSE_XMAX = 1.0, 7.0
LEFT_XMIN, LEFT_XMAX = 1e-5, 0.01
RIGHT_XMIN, RIGHT_XMAX = 7.0, 20.0

# table_scale = 2 / 0.01 / (qint16.max - qint16.min)
TABLE_SCALE = 2.0 / 0.01 / (QINT16_MAX - QINT16_MIN)
INV_TABLE_SCALE = 1.0 / TABLE_SCALE

# linear flank fits in y = A*x + B form (slopes are negative -> constant fits via min/max)
LEFT_Y0, LEFT_Y1 = 1.0 / LEFT_XMIN, 1.0 / LEFT_XMAX
LEFT_A = (LEFT_Y1 - LEFT_Y0) / (LEFT_XMAX - LEFT_XMIN)
LEFT_B = LEFT_Y0 - LEFT_XMIN * LEFT_A
RIGHT_Y0, RIGHT_Y1 = 1.0 / RIGHT_XMIN, 1.0 / RIGHT_XMAX
RIGHT_A = (RIGHT_Y1 - RIGHT_Y0) / (RIGHT_XMAX - RIGHT_XMIN)
RIGHT_B = RIGHT_Y0 - RIGHT_XMIN * RIGHT_A

# ------------------------------------ tiling -----------------------------------------
LANE_WIDTH = 1024       # lane-dense slab width (multiple of 128 -> unmasked, dense stores)
MAX_BLOCK_ROWS = 1024   # (1024, 1024) int16 block = 2 MiB per input per grid step


# --------------------------------- Pallas kernel -------------------------------------
def _div_kernel(x1_ref, x2_ref, out_ref, *, s2, inv_table_scale, requant):
    q1 = x1_ref[...].astype(jnp.float32)
    x2 = x2_ref[...].astype(jnp.float32) * s2      # dequantize divisor (zero_point = 0)

    ax = jnp.abs(x2)
    safe_ax = jnp.maximum(ax, 1e-30)               # also guards garbage rows of a ragged block

    # dense [0.01, 1] + sparse [1, 7] regions: the reciprocal the LUTs tabulate.
    # EUP approximate reciprocal + one Newton refinement: the divide leaves the saturating
    # VALU slot; the Newton step keeps it ~f32-exact so recip_q bins match exact 1/x.
    # TODO(synk): the HW path indexes 256-entry dense/sparse int16 LUTs; evaluating the
    #             reciprocal directly can differ by ~1 LSB near LUT bin edges.
    r = pl.reciprocal(safe_ax, approx=True)
    inv = r * (2.0 - safe_ax * r)

    # left linear fit on [1e-5, 0.01], constant fit below 1e-5 (negative slope -> min)
    left = jnp.minimum(LEFT_A * ax + LEFT_B, LEFT_Y0)
    # right linear fit on [7, 20], constant fit above 20 (negative slope -> max)
    right = jnp.maximum(RIGHT_A * ax + RIGHT_B, RIGHT_Y1)

    y = jnp.where(ax < DENSE_XMIN, left, inv)
    y = jnp.where(ax > SPARSE_XMAX, right, y)

    # quantize reciprocal to qint16 with table_scale; is_symmetric=True odd extension is
    # folded into the sign of the quantize multiplier (saves a negate on the VALU path).
    # TODO(synk): jnp.round is round-half-to-even; the plugin's rounding mode may be
    #             half-away-from-zero (differs only on exact .5 ties).
    q_scale = jnp.where(x2 < 0.0, -inv_table_scale, inv_table_scale)
    recip_q = jnp.clip(jnp.round(y * q_scale), QINT16_MIN, QINT16_MAX)

    # quantized multiply: (q1*s1) * (recip_q*table_scale) / out_scale -> qint16
    out = jnp.clip(jnp.round(q1 * recip_q * requant), QINT16_MIN, QINT16_MAX)
    out_ref[...] = out.astype(jnp.int16)


# ----------------------------- pure-jnp piecewise math -------------------------------
def _piecewise_recip_q(q2_i16, s2):
    """Pure-JAX mirror of the piecewise reciprocal quantization (exact 1/x)."""
    x2 = q2_i16.astype(jnp.float32) * s2
    ax = jnp.abs(x2)
    inv = 1.0 / jnp.maximum(ax, 1e-30)
    left = jnp.minimum(LEFT_A * ax + LEFT_B, LEFT_Y0)
    right = jnp.maximum(RIGHT_A * ax + RIGHT_B, RIGHT_Y1)
    y = jnp.where(ax < DENSE_XMIN, left, inv)
    y = jnp.where(ax > SPARSE_XMAX, right, y)
    q_scale = jnp.where(x2 < 0.0, -INV_TABLE_SCALE, INV_TABLE_SCALE)
    return jnp.clip(jnp.round(y * q_scale), QINT16_MIN, QINT16_MAX)


def _jnp_div(q1_i16, q2_i16, s2, requant):
    """Tiny plain-jnp epilogue for the <1024-element tail (and the reference)."""
    recip_q = _piecewise_recip_q(q2_i16, s2)
    out = jnp.clip(jnp.round(q1_i16.astype(jnp.float32) * recip_q * requant),
                   QINT16_MIN, QINT16_MAX)
    return out.astype(jnp.int16)


# --------------------------------- pallas dispatch ------------------------------------
def _pick_block_rows(rows):
    """Largest block <= MAX_BLOCK_ROWS that still yields >= 2 grid steps (v7x megacore),
    rounded up to a multiple of 8 (sublane tiling)."""
    if rows <= 8:
        return rows                          # full-dim block (always legal)
    half = -(-rows // 2)
    return min(MAX_BLOCK_ROWS, ((half + 7) // 8) * 8)


def _run_pallas(x1_2d, x2_2d, s2, requant):
    rows = x1_2d.shape[0]
    n = rows * LANE_WIDTH
    block_rows = _pick_block_rows(rows)
    grid = (pl.cdiv(rows, block_rows),)      # ragged last block is masked by Pallas

    kernel = functools.partial(
        _div_kernel, s2=s2, inv_table_scale=INV_TABLE_SCALE, requant=requant)

    return pl.pallas_call(
        kernel,
        out_shape=jax.ShapeDtypeStruct((rows, LANE_WIDTH), jnp.int16),
        grid=grid,
        in_specs=[
            pl.BlockSpec((block_rows, LANE_WIDTH), lambda i: (i, 0)),
            pl.BlockSpec((block_rows, LANE_WIDTH), lambda i: (i, 0)),
        ],
        out_specs=pl.BlockSpec((block_rows, LANE_WIDTH), lambda i: (i, 0)),
        compiler_params=pltpu.CompilerParams(
            dimension_semantics=("parallel",),
            vmem_limit_bytes=32 * 1024 * 1024,   # safe on v5e/v6e (128 MiB) and v7x (64 MiB)
        ),
        cost_estimate=pl.CostEstimate(
            flops=30 * n, transcendentals=n, bytes_accessed=6 * n),
    )(x1_2d, x2_2d)


# --------------------------------- wrapper (glue) ------------------------------------
def quantized_div(data1_int16, data2_int16, s1, s2, out_scale):
    """data1_int16 / data2_int16 are int16 int_reprs (any shape, e.g. NCHW).

    Returns the int16 int_repr of the result quantized with `out_scale` (qint16)."""
    assert data1_int16.shape == data2_int16.shape
    orig_shape = data1_int16.shape
    n = data1_int16.size

    s2 = float(s2)
    requant = float(s1) * TABLE_SCALE / float(out_scale)

    x1 = data1_int16.reshape(-1)
    x2 = data2_int16.reshape(-1)

    n_aligned = (n // LANE_WIDTH) * LANE_WIDTH
    rem = n - n_aligned

    pieces = []
    if n_aligned:
        rows = n_aligned // LANE_WIDTH
        if rem:
            a1 = x1[:n_aligned].reshape(rows, LANE_WIDTH)
            a2 = x2[:n_aligned].reshape(rows, LANE_WIDTH)
        else:
            a1 = x1.reshape(rows, LANE_WIDTH)   # pure reshape, no copy / pad
            a2 = x2.reshape(rows, LANE_WIDTH)
        pieces.append(_run_pallas(a1, a2, s2, requant).reshape(-1))
    if rem:
        # <1024-element tail: plain-jnp epilogue avoids a full-tensor pad+slice HBM pass.
        pieces.append(_jnp_div(x1[n_aligned:], x2[n_aligned:], s2, requant))

    out = pieces[0] if len(pieces) == 1 else jnp.concatenate(pieces)
    return out.reshape(orig_shape)


# ----------------------- pure-JAX reference (module semantics) -----------------------
def _reference_div(q1_i16, q2_i16, s1, s2, out_scale):
    requant = float(s1) * TABLE_SCALE / float(out_scale)
    return _jnp_div(q1_i16, q2_i16, float(s2), requant).astype(jnp.int32)


# ----------------------------------- demo / check ------------------------------------
if __name__ == "__main__":
    key = jax.random.PRNGKey(0)
    k1, k2, k3, k4 = jax.random.split(key, 4)

    # deterministic quantization scales (module buffers / q_scales), synthetic values
    s1 = 0.002        # data1.q_scale()
    s2 = 0.004        # data2.q_scale()
    out_scale = 0.05  # self.scale buffer

    def _make_inputs(ka, kb, shape):
        f1 = jax.random.uniform(ka, shape, minval=-40.0, maxval=40.0)
        f2 = jax.random.uniform(kb, shape, minval=0.05, maxval=10.0)  # divisor
        q1 = jnp.clip(jnp.round(f1 / s1), QINT16_MIN, QINT16_MAX).astype(jnp.int16)
        q2 = jnp.clip(jnp.round(f2 / s2), QINT16_MIN, QINT16_MAX).astype(jnp.int16)
        return q1, q2

    # primary case: lane-aligned NCHW tensor
    shape = (2, 4, 16, 16)
    q1, q2 = _make_inputs(k1, k2, shape)
    out_q = jax.block_until_ready(quantized_div(q1, q2, s1, s2, out_scale))
    assert out_q.shape == shape and out_q.dtype == jnp.int16

    # match the module's piecewise-table semantics (pure-JAX mirror); small LSB slack for
    # the approx+Newton reciprocal and independent rounding between Mosaic and XLA.
    ref_q = _reference_div(q1, q2, s1, s2, out_scale)
    max_lsb = int(jnp.max(jnp.abs(out_q.astype(jnp.int32) - ref_q)))
    assert max_lsb <= 4, f"mismatch vs piecewise reference: {max_lsb} LSB"

    # secondary sanity check vs true float division, restricted to the dense region
    # (|x2| in [0.02, 0.9]) where the piecewise fit is the exact reciprocal; tolerance
    # covers the recip_q quantization (table_scale) and the two requantization rounds.
    x2f = q2.astype(jnp.float32) * s2
    dense_mask = (jnp.abs(x2f) >= 0.02) & (jnp.abs(x2f) <= 0.9)
    true_div = (q1.astype(jnp.float32) * s1) / x2f
    true_q = jnp.clip(jnp.round(true_div / out_scale), QINT16_MIN, QINT16_MAX)
    err = jnp.max(jnp.where(dense_mask,
                            jnp.abs(out_q.astype(jnp.float32) - true_q), 0.0)) * out_scale
    assert float(err) < 0.3, f"dense-region dequantized error too large: {float(err)}"

    # non-aligned case: exercises the Pallas prefix + jnp tail path (2145 = 2*1024 + 97)
    shape_b = (5, 3, 11, 13)
    q1b, q2b = _make_inputs(k3, k4, shape_b)
    out_b = jax.block_until_ready(quantized_div(q1b, q2b, s1, s2, out_scale))
    ref_b = _reference_div(q1b, q2b, s1, s2, out_scale)
    max_lsb_b = int(jnp.max(jnp.abs(out_b.astype(jnp.int32) - ref_b)))
    assert out_b.shape == shape_b and out_b.dtype == jnp.int16
    assert max_lsb_b <= 4, f"ragged-case mismatch vs piecewise reference: {max_lsb_b} LSB"

    print("KERNEL_OK")
</pallas_src>

<mosaic_0001>
module attributes {stable_mosaic.version = 11 : i64} {
  func.func @_div_kernel(%arg0: i32, %arg1: memref<2x1024xi16, #tpu.memory_space<vmem>>, %arg2: memref<2x1024xi16, #tpu.memory_space<vmem>>, %arg3: memref<2x1024xi16, #tpu.memory_space<vmem>>) attributes {dimension_semantics = [#tpu.dimension_semantics<parallel>], iteration_bounds = array<i64: 1>, scalar_prefetch = 0 : i64, scratch_operands = 0 : i64, tpu.core_type = #tpu.core_type<tc>, window_params = [{transform_indices = @transform_0, window_bounds = array<i64: 2, 1024>}, {transform_indices = @transform_1, window_bounds = array<i64: 2, 1024>}, {transform_indices = @transform_2, window_bounds = array<i64: 2, 1024>}]} {
    %c0 = arith.constant 0 : index
    %c0_0 = arith.constant 0 : index
    %0 = vector.load %arg1[%c0, %c0_0] : memref<2x1024xi16, #tpu.memory_space<vmem>>, vector<2x1024xi16>
    %1 = arith.sitofp %0 : vector<2x1024xi16> to vector<2x1024xf32>
    %c0_1 = arith.constant 0 : index
    %c0_2 = arith.constant 0 : index
    %2 = vector.load %arg2[%c0_1, %c0_2] : memref<2x1024xi16, #tpu.memory_space<vmem>>, vector<2x1024xi16>
    %3 = arith.sitofp %2 : vector<2x1024xi16> to vector<2x1024xf32>
    %cst = arith.constant 4.000000e-03 : f32
    %4 = vector.broadcast %cst : f32 to vector<2x1024xf32>
    %5 = arith.mulf %3, %4 : vector<2x1024xf32>
    %6 = math.absf %5 : vector<2x1024xf32>
    %cst_3 = arith.constant 1.000000e-30 : f32
    %7 = vector.broadcast %cst_3 : f32 to vector<2x1024xf32>
    %8 = arith.maximumf %6, %7 : vector<2x1024xf32>
    %9 = tpu.reciprocal %8 {approx = true} : vector<2x1024xf32> -> vector<2x1024xf32>
    %10 = arith.mulf %8, %9 : vector<2x1024xf32>
    %cst_4 = arith.constant 2.000000e+00 : f32
    %11 = vector.broadcast %cst_4 : f32 to vector<2x1024xf32>
    %12 = arith.subf %11, %10 : vector<2x1024xf32>
    %13 = arith.mulf %9, %12 : vector<2x1024xf32>
    %cst_5 = arith.constant -1.000000e+07 : f32
    %14 = vector.broadcast %cst_5 : f32 to vector<2x1024xf32>
    %15 = arith.mulf %14, %6 : vector<2x1024xf32>
    %cst_6 = arith.constant 1.001000e+05 : f32
    %16 = vector.broadcast %cst_6 : f32 to vector<2x1024xf32>
    %17 = arith.addf %15, %16 : vector<2x1024xf32>
    %cst_7 = arith.constant 1.000000e+05 : f32
    %18 = vector.broadcast %cst_7 : f32 to vector<2x1024xf32>
    %19 = arith.minimumf %17, %18 : vector<2x1024xf32>
    %cst_8 = arith.constant -0.00714285718 : f32
    %20 = vector.broadcast %cst_8 : f32 to vector<2x1024xf32>
    %21 = arith.mulf %20, %6 : vector<2x1024xf32>
    %cst_9 = arith.constant 0.192857146 : f32
    %22 = vector.broadcast %cst_9 : f32 to vector<2x1024xf32>
    %23 = arith.addf %21, %22 : vector<2x1024xf32>
    %cst_10 = arith.constant 5.000000e-02 : f32
    %24 = vector.broadcast %cst_10 : f32 to vector<2x1024xf32>
    %25 = arith.maximumf %23, %24 : vector<2x1024xf32>
    %cst_11 = arith.constant 0.00999999977 : f32
    %26 = vector.broadcast %cst_11 : f32 to vector<2x1024xf32>
    %27 = arith.cmpf olt, %6, %26 : vector<2x1024xf32>
    %28 = arith.select %27, %19, %13 : vector<2x1024xi1>, vector<2x1024xf32>
    %cst_12 = arith.constant 7.000000e+00 : f32
    %29 = vector.broadcast %cst_12 : f32 to vector<2x1024xf32>
    %30 = arith.cmpf ogt, %6, %29 : vector<2x1024xf32>
    %31 = arith.select %30, %25, %28 : vector<2x1024xi1>, vector<2x1024xf32>
    %cst_13 = arith.constant 0.000000e+00 : f32
    %32 = vector.broadcast %cst_13 : f32 to vector<2x1024xf32>
    %33 = arith.cmpf olt, %5, %32 : vector<2x1024xf32>
    %cst_14 = arith.constant -3.276750e+02 : f32
    %cst_15 = arith.constant 3.276750e+02 : f32
    %34 = vector.broadcast %cst_14 : f32 to vector<2x1024xf32>
    %35 = vector.broadcast %cst_15 : f32 to vector<2x1024xf32>
    %36 = arith.select %33, %34, %35 : vector<2x1024xi1>, vector<2x1024xf32>
    %37 = arith.mulf %31, %36 : vector<2x1024xf32>
    %38 = math.roundeven %37 : vector<2x1024xf32>
    %cst_16 = arith.constant -3.276800e+04 : f32
    %cst_17 = arith.constant 3.276700e+04 : f32
    %39 = vector.broadcast %cst_16 : f32 to vector<2x1024xf32>
    %40 = arith.maximumf %39, %38 : vector<2x1024xf32>
    %41 = vector.broadcast %cst_17 : f32 to vector<2x1024xf32>
    %42 = arith.minimumf %41, %40 : vector<2x1024xf32>
    %43 = arith.mulf %1, %42 : vector<2x1024xf32>
    %cst_18 = arith.constant 1.22072175E-4 : f32
    %44 = vector.broadcast %cst_18 : f32 to vector<2x1024xf32>
    %45 = arith.mulf %43, %44 : vector<2x1024xf32>
    %46 = math.roundeven %45 : vector<2x1024xf32>
    %cst_19 = arith.constant -3.276800e+04 : f32
    %cst_20 = arith.constant 3.276700e+04 : f32
    %47 = vector.broadcast %cst_19 : f32 to vector<2x1024xf32>
    %48 = arith.maximumf %47, %46 : vector<2x1024xf32>
    %49 = vector.broadcast %cst_20 : f32 to vector<2x1024xf32>
    %50 = arith.minimumf %49, %48 : vector<2x1024xf32>
    %51 = arith.fptosi %50 : vector<2x1024xf32> to vector<2x1024xi16>
    %c0_21 = arith.constant 0 : index
    %c0_22 = arith.constant 0 : index
    %52 = vector.load %arg3[%c0_21, %c0_22] : memref<2x1024xi16, #tpu.memory_space<vmem>>, vector<2x1024xi16>
    tpu.vector_store %arg3[%c0_21, %c0_22], %51 {strides = array<i32>} : memref<2x1024xi16, #tpu.memory_space<vmem>>, vector<2x1024xi16>,
    return
  }
  func.func @transform_0(%arg0: i32) -> (i32, i32) {
    %c0_i32 = arith.constant 0 : i32
    %c0_i32_0 = arith.constant 0 : i32
    return %arg0, %c0_i32 : i32, i32
  }
  func.func @transform_1(%arg0: i32) -> (i32, i32) {
    %c0_i32 = arith.constant 0 : i32
    %c0_i32_0 = arith.constant 0 : i32
    return %arg0, %c0_i32 : i32, i32
  }
  func.func @transform_2(%arg0: i32) -> (i32, i32) {
    %c0_i32 = arith.constant 0 : i32
    %c0_i32_0 = arith.constant 0 : i32
    return %arg0, %c0_i32 : i32, i32
  }
}

</mosaic_0001>

<bundles_post_ra>
// kernel: tpu_custom_call.1
= control target key start
LH: loop header
LB: loop body
LE: loop exit
PB: predicated region body
PF: predicated region fallthrough
CT: control target
= control target key end

     0   :  { %7 = vsyncpa [#allocation3], 0  ;;  %s326_s0 = inlined_call_operand.hbm [shape: s16[2,1024], index: 0, kind: input, shape index: {}]   ;;  %s327_s1 = inlined_call_operand.hbm [shape: s16[2,1024], index: 1, kind: input, shape index: {}]   ;;  %s328_s2 = inlined_call_operand.hbm [shape: s16[2,1024], index: 2, kind: output, shape index: {}]  }
   0x1   :  { %8 = vsyncpa [#allocation6], 0 }
   0x2   :  { %9 = vsyncpa [#allocation4], 0  ;;  %s15_s11 = sshll.u32 %s326_s0, 4  ;;  %s294_s12 = smov [#allocation2]   ;;  %s16_s11 = int_to_ptr.hbm [resolvable:$true] %s15_s11 }
   0x3   :  { %s17_s13 = sshll.u32 %s294_s12, 4  ;;  %s26_s16 = sshll.u32 %s327_s1, 4  ;;  %s18_s13 = int_to_ptr.vmem [resolvable:$true] %s17_s13  ;;  %s27_s16 = int_to_ptr.hbm [resolvable:$true] %s26_s16 }
   0x4   :  { %20 = dma.hbm_to_vmem [thread:$0]  %s16_s11, 128, %s18_s13, [#allocation3]  }
   0x5   :  { %s295_s17 = smov [#allocation5]  }
   0x6   :  { %s28_s18 = sshll.u32 %s295_s17, 4  ;;  %s29_s18 = int_to_ptr.vmem [resolvable:$true] %s28_s18 }
   0x7   :  { %31 = dma.hbm_to_vmem [thread:$0]  %s27_s16, 128, %s29_s18, [#allocation6]  }
   0x8   :  { %288 = dma.done.wait [#allocation3], 128  }
   0x9   :  { %289 = vsyncadd [#allocation3], 4294967168 }
   0xa   :  { %290 = dma.done.wait [#allocation6], 128  }
   0xb   :  { %291 = vsyncadd [#allocation6], 4294967168  ;;  %v45_v0 = vld [vmem:[#allocation5] sm:$0xff]  ;;  %v296_v30 = vmov 327.675   ;;  %v40_v43 = vld [vmem:[#allocation2] sm:$0xff] }
   0xc   :  { %v46_v1 = vunpack.c.l.b16 %v45_v0  ;;  %v47_v2 = vunpack.c.h.b16 %v45_v0  ;;  %v41_v50 = vunpack.c.l.b16 %v40_v43  ;;  %v42_v53 = vunpack.c.h.b16 %v40_v43  ;;  %s297_s0 = smov [#allocation7]   ;;  %s165_s21 = sshll.u32 %s328_s2, 4  ;;  %s166_s21 = int_to_ptr.hbm [resolvable:$true] %s165_s21 }
   0xd   :  { %vm134_vm8 = vcmask 1040384   ;;  %vm138_vm9 = vcmask 1042434   ;;  %vm142_vm10 = vcmask 1041408   ;;  %vm144_vm11 = vcmask 1044484   ;;  %s163_s1 = sshll.u32 %s297_s0, 4  ;;  %s164_s1 = int_to_ptr.vmem [resolvable:$true] %s163_s1 }
   0xe   :  { %v48_v3 = vcvt.s32.f32 %v46_v1  ;;  %v49_v4 = vcvt.s32.f32 %v47_v2  ;;  %v43_v56 = vcvt.s32.f32 %v41_v50  ;;  %v44_v59 = vcvt.s32.f32 %v42_v53 }
   0xf   :  { %vm148_vm12 = vcmask 1046534   ;;  %vm152_vm13 = vcmask 1045508   ;;  %vm154_vm14 = vcmask 1043456  }
  0x10   :  { %v50_v5 = vmul.f32 0.004, %v48_v3  ;;  %v51_v6 = vmul.f32 0.004, %v49_v4 }
  0x12   :  { %v52_v7 = vand.u32 2147483647, %v50_v5  ;;  %v53_v8 = vand.u32 2147483647, %v51_v6  ;;  %vm84_vm0 = vcmp.lt.f32.partialorder %v50_v5, 0.0  ;;  %vm85_vm1 = vcmp.lt.f32.partialorder %v51_v6, 0.0 }
  0x13   :  { %v86_v31 = vsel %vm84_vm0, -327.675, %v296_v30  ;;  %v87_v34 = vsel %vm85_vm1, -327.675, %v296_v30 }
  0x14   :  { %v54_v9 = vmax.f32 %v52_v7, 1e-30  ;;  %v55_v10 = vmax.f32 %v53_v8, 1e-30  ;;  %v64_v11 = vmul.f32 -10000000.0, %v52_v7 }
  0x15   :  { %v70_v12 = vmul.f32 -0.007142857, %v52_v7  ;;  %v65_v13 = vmul.f32 -10000000.0, %v53_v8  ;;  %v71_v14 = vmul.f32 -0.007142857, %v53_v8 }
  0x16   :  { %212 = vrcp.f32 %v54_v9  ;;  %v66_v15 = vadd.f32 100100.0, %v64_v11  ;;  %vm76_vm2 = vcmp.lt.f32.partialorder %v52_v7, 0.01  ;;  %vm80_vm3 = vcmp.gt.f32.partialorder %v52_v7, 7.0 }
  0x17   :  { %214 = vrcp.f32 %v55_v10  ;;  %v72_v17 = vadd.f32 0.19285715, %v70_v12  ;;  %v67_v18 = vadd.f32 100100.0, %v65_v13  ;;  %v73_v21 = vadd.f32 0.19285715, %v71_v14 }
  0x18   :  { %v68_v24 = vmin.f32 %v66_v15, 100000.0  ;;  %vm77_vm4 = vcmp.lt.f32.partialorder %v53_v8, 0.01  ;;  %vm81_vm5 = vcmp.gt.f32.partialorder %v53_v8, 7.0 }
  0x19   :  { %v74_v25 = vmax.f32 %v72_v17, 0.05  ;;  %v69_v27 = vmin.f32 %v67_v18, 100000.0  ;;  %v75_v29 = vmax.f32 %v73_v21, 0.05 }
  0x1c   :  { %v213_v16 = vpop.eup %212 }
  0x1d   :  { %v215_v19 = vpop.eup %214  ;;  %v58_v20 = vmul.f32 %v213_v16, %v54_v9 }
  0x1e   :  { %v59_v22 = vmul.f32 %v215_v19, %v55_v10 }
  0x1f   :  { %v60_v23 = vsub.f32 2.0, %v58_v20 }
  0x20   :  { %v61_v26 = vsub.f32 2.0, %v59_v22 }
  0x21   :  { %v62_v28 = vmul.f32 %v213_v16, %v60_v23 }
  0x22   :  { %v63_v32 = vmul.f32 %v215_v19, %v61_v26 }
  0x23   :  { %v78_v33 = vsel %vm76_vm2, %v68_v24, %v62_v28 }
  0x24   :  { %v82_v35 = vsel %vm80_vm3, %v74_v25, %v78_v33  ;;  %v79_v36 = vsel %vm77_vm4, %v69_v27, %v63_v32 }
  0x25   :  { %v88_v37 = vmul.f32 %v86_v31, %v82_v35  ;;  %v83_v38 = vsel %vm81_vm5, %v75_v29, %v79_v36 }
  0x26   :  { %v89_v39 = vmul.f32 %v87_v34, %v83_v38 }
  0x27   :  { %v188_v40 = vcvt.f32.s32 %v88_v37  ;;  %v186_v41 = vand.u32 2147483647, %v88_v37  ;;  %v191_v45 = vand.u32 2147483648, %v88_v37 }
  0x28   :  { %v196_v42 = vcvt.f32.s32 %v89_v39  ;;  %v194_v46 = vand.u32 2147483647, %v89_v39  ;;  %v199_v48 = vand.u32 2147483648, %v89_v39 }
  0x29   :  { %v189_v44 = vcvt.s32.f32 %v188_v40  ;;  %vm187_vm6 = vcmp.lt.f32.partialorder %v186_v41, 8388608.0 }
  0x2a   :  { %v197_v47 = vcvt.s32.f32 %v196_v42  ;;  %vm195_vm7 = vcmp.lt.f32.partialorder %v194_v46, 8388608.0 }
  0x2b   :  { %v190_v49 = vand.u32 2147483647, %v189_v44 }
  0x2c   :  { %v198_v51 = vand.u32 2147483647, %v197_v47 }
  0x2d   :  { %v192_v52 = vor.u32 %v191_v45, %v190_v49 }
  0x2e   :  { %v200_v54 = vor.u32 %v199_v48, %v198_v51 }
  0x2f   :  { %v193_v55 = vsel %vm187_vm6, %v192_v52, %v88_v37 }
  0x30   :  { %v92_v57 = vmax.f32 %v193_v55, -32768.0  ;;  %v201_v58 = vsel %vm195_vm7, %v200_v54, %v89_v39 }
  0x31   :  { %v93_v60 = vmax.f32 %v201_v58, -32768.0 }
  0x32   :  { %v94_v61 = vmin.f32 %v92_v57, 32767.0 }
  0x33   :  { %v95_v62 = vmin.f32 %v93_v60, 32767.0 }
  0x34   :  { %v96_v63 = vmul.f32 %v94_v61, %v43_v56 }
  0x35   :  { %v97_v0 = vmul.f32 %v95_v62, %v44_v59 }
  0x36   :  { %v98_v1 = vmul.f32 0.00012207218, %v96_v63 }
  0x37   :  { %v99_v2 = vmul.f32 0.00012207218, %v97_v0 }
  0x38   :  { %v180_v3 = vmax.f32 %v98_v1, -32768.0 }
  0x39   :  { %v183_v4 = vmax.f32 %v99_v2, -32768.0 }
  0x3a   :  { %v181_v5 = vmin.f32 %v180_v3, 32767.0 }
  0x3b   :  { %v184_v6 = vmin.f32 %v183_v4, 32767.0 }
  0x3c   :  { %v204_v7 = vcvt.f32.s32 %v181_v5 }
  0x3d   :  { %v207_v8 = vcvt.f32.s32 %v184_v6 }
  0x3e   :  { %112 = vst [vmem:[#allocation1] ss:$4 sm:$0xff] %v204_v7 }
  0x3f   :  { %114 = vst [vmem:[#allocation1 + $0x20] ss:$4 sm:$0xff] %v207_v8 }
  0x45   :  { %v115_v9 = vld.sshfl [vmem:[#allocation1] sm:$0xff pattern:$0x73625140]  ;;  %v116_v10 = vld.sshfl [vmem:[#allocation1 + $0x8] sm:$0xff pattern:$0x73625140] }
  0x46   :  { %v117_v11 = vld.sshfl [vmem:[#allocation1 + $0x10] sm:$0xff pattern:$0x73625140]  ;;  %v118_v12 = vld.sshfl [vmem:[#allocation1 + $0x18] sm:$0xff pattern:$0x73625140]  ;;  %v123_v13 = vpack.c.b16 %v116_v10, %v115_v9 }
  0x47   :  { %v119_v14 = vld.sshfl [vmem:[#allocation1 + $0x20] sm:$0xff pattern:$0x73625140]  ;;  %v120_v15 = vld.sshfl [vmem:[#allocation1 + $0x28] sm:$0xff pattern:$0x73625140]  ;;  %v124_v16 = vpack.c.b16 %v118_v12, %v117_v11 }
  0x48   :  { %v121_v17 = vld.sshfl [vmem:[#allocation1 + $0x30] sm:$0xff pattern:$0x73625140]  ;;  %v122_v18 = vld.sshfl [vmem:[#allocation1 + $0x38] sm:$0xff pattern:$0x73625140]  ;;  %v125_v19 = vpack.c.b16 %v120_v15, %v119_v14 }
  0x49   :  { %v126_v20 = vpack.c.b16 %v122_v18, %v121_v17  ;;  %v127_v21 = vrot.slane %v123_v13, 3  ;;  %v128_v22 = vrot.slane %v124_v16, 6  ;;  %v129_v23 = vrot.slane %v124_v16, 1 }
  0x4a   :  { %v130_v24 = vrot.slane %v125_v19, 4  ;;  %v131_v25 = vrot.slane %v125_v19, 7 }
  0x4b   :  { %v132_v26 = vrot.slane %v126_v20, 2  ;;  %v133_v27 = vrot.slane %v126_v20, 5  ;;  %v137_v28 = vsel %vm134_vm8, %v123_v13, %v127_v21  ;;  %v141_v29 = vsel %vm138_vm9, %v128_v22, %v129_v23 }
  0x4c   :  { %v143_v30 = vsel %vm142_vm10, %v137_v28, %v141_v29  ;;  %v147_v31 = vsel %vm144_vm11, %v130_v24, %v131_v25 }
  0x4d   :  { %v151_v32 = vsel %vm148_vm12, %v132_v26, %v133_v27 }
  0x4e   :  { %v153_v33 = vsel %vm152_vm13, %v147_v31, %v151_v32 }
  0x4f   :  { %v155_v34 = vsel %vm154_vm14, %v143_v30, %v153_v33 }
  0x50   :  { %157 = vst [vmem:[#allocation7] sm:$0xff] %v155_v34 }
  0x51   :  { %168 = dma.vmem_to_hbm [thread:$0]  %s164_s1, 128, %s166_s21, [#allocation4]  }
  0x52   :  { %292 = dma.done.wait [#allocation4], 128  }
  0x53   :  { %293 = vsyncadd [#allocation4], 4294967168 }
  0x54   :  { %173 = vsyncpa [#allocation3], 1 }
  0x55   :  { %174 = vsyncpa [#allocation6], 1 }
  0x56   :  { %175 = vsyncpa [#allocation4], 1 }

</bundles_post_ra>
